<compile_context>
chip_gen: v7x
topology: tpu7x:2x2x1
jax: 0.10.0
libtpu: 0.0.40
codegen_flags: <defaults>
</compile_context>

<pallas_src>
import functools

import jax
import jax.numpy as jnp
from jax import lax
from jax.experimental import pallas as pl
from jax.experimental.pallas import tpu as pltpu


_LAYER_SIZES = (256, 128, 64, 32, 1)


def mlp_kernel(x_ref,
               w1_ref, b1_ref,
               w2_ref, b2_ref,
               w3_ref, b3_ref,
               w4_ref, b4_ref,
               w5_ref, b5_ref,
               o_ref, *, matmul_dtype, act_dtype):
    """Whole 5-layer MLP fused.

    Activations are feature-major (features, batch_tile): the batch lives on
    the 128-wide lane axis, so every intermediate — and the final
    (1, batch_tile) output — is lane-dense (unmasked vst, dense writeback DMA).
    Weights stay in the PyTorch nn.Linear (out, in) layout; the kernel
    computes y_t = W @ h_t + b, identical math to torch's x @ W.T + b.
    """

    def hidden(h_prev, w_ref, b_ref):
        # MXU matmul, f32 accumulation. Operands in matmul_dtype (bf16 by
        # default: full MXU rate on every TPU generation).
        y = jnp.dot(w_ref[...], h_prev.astype(matmul_dtype),
                    preferred_element_type=jnp.float32) + b_ref[...]
        # tanh runs on the single EUP — the binding unit at these layer
        # widths. act_dtype=bf16 on v6e/v7x halves the EUP element count;
        # v5e keeps act_dtype=f32 (no bf16 VPU/EUP).
        return jnp.tanh(y.astype(act_dtype))

    # Layer 1: x arrives in natural (batch_tile, IN) layout (no wrapper-side
    # transpose). Contract the IN axes of W1 (256, IN) and x (batch_tile, IN)
    # directly — the result (256, batch_tile) is already feature-major.
    x = x_ref[...].astype(matmul_dtype)
    y1 = lax.dot_general(
        w1_ref[...], x,
        dimension_numbers=(((1,), (1,)), ((), ())),
        preferred_element_type=jnp.float32) + b1_ref[...]
    h = jnp.tanh(y1.astype(act_dtype))

    h = hidden(h, w2_ref, b2_ref)
    h = hidden(h, w3_ref, b3_ref)
    h = hidden(h, w4_ref, b4_ref)

    # Layer 5 (32 -> 1): single output row. Skip the MXU (a 1-row matmul
    # wastes a weight-register reload + a ~1/256-utilized pass); do a VPU
    # broadcast-multiply + XLU sublane reduce instead — both units have slack.
    # w5_ref is pre-shaped (32, 1) f32 by the wrapper.
    y5 = jnp.sum(w5_ref[...] * h.astype(jnp.float32), axis=0, keepdims=True)
    o_ref[...] = (y5 + b5_ref[...]).astype(o_ref.dtype)


def _ceil_div(a, b):
    return -(-a // b)


def _auto_dtypes():
    """Per-generation defaults.

    matmul operands: bf16 everywhere (full MXU rate, f32 accumulation keeps
    accuracy). Activations/tanh: bf16 only where the VPU/EUP support it
    (v6e/v7x); f32 otherwise (v5e and older).
    """
    try:
        kind = jax.devices()[0].device_kind.lower()
    except Exception:  # pragma: no cover - defensive
        kind = ""
    matmul_dtype = jnp.bfloat16
    act_dtype = jnp.bfloat16 if ("v6" in kind or "v7" in kind) else jnp.float32
    return matmul_dtype, act_dtype


def _pick_batch_tile(B, max_tile=2048):
    """Largest useful lane-dense tile, but >=2 grid steps when possible.

    Per-grid-step overhead is ~0.35us, so tiles well above 512 are needed to
    amortize it; >=2 steps lets input/output DMAs pipeline against compute and
    lets the 'parallel' axis be sharded across TensorCores (v7x has 2).
    Activation footprint is ~2 KB/batch-elem f32, so 2048 stays far under the
    v7x 64 MiB VMEM (see vmem_limit sizing below).
    """
    if B <= 128:
        return 128
    steps = max(_ceil_div(B, max_tile), 2 if B >= 256 else 1)
    return _ceil_div(_ceil_div(B, steps), 128) * 128


def mlp_forward(x, params, *, batch_tile=None, matmul_dtype=None,
                act_dtype=None):
    """x: (B, input_size) f32. params: list of (W (out,in), b (out,)).

    matmul_dtype / act_dtype default to per-chip choices (_auto_dtypes).
    Pass jnp.float32 for both to get an exact (reference-matching) path.
    """
    B, IN = x.shape
    assert len(params) == 5

    auto_mm, auto_act = _auto_dtypes()
    if matmul_dtype is None:
        matmul_dtype = auto_mm
    if act_dtype is None:
        act_dtype = auto_act

    if batch_tile is None:
        batch_tile = _pick_batch_tile(B)
    grid = _ceil_div(B, batch_tile)
    Bp = grid * batch_tile
    if Bp != B:
        # Zero-pad the batch up to a tile multiple; sliced off afterwards.
        x = jnp.pad(x, ((0, Bp - B), (0, 0)))

    (w1, b1), (w2, b2), (w3, b3), (w4, b4), (w5, b5) = params
    # Hidden-layer weights in matmul_dtype (bf16: full MXU rate + half the
    # weight DMA bytes). Biases and the tiny final-layer weight stay f32
    # (accumulator add / VPU path). ~180 KB of one-time wrapper casts.
    ws = [w.astype(matmul_dtype) for w in (w1, w2, w3, w4)]
    bs = [b.reshape(-1, 1).astype(jnp.float32) for b in (b1, b2, b3, b4, b5)]
    w5_col = w5.reshape(-1, 1).astype(jnp.float32)          # (32, 1)

    def resident(arr):
        # Whole weight/bias resident in VMEM at every grid step (constant
        # index_map). pipeline_mode=pl.Buffered(1) would drop the dead second
        # buffer (~180 KB total today) — skipped as noise at this size.
        return pl.BlockSpec(arr.shape, lambda i: (0, 0))

    in_specs = [pl.BlockSpec((batch_tile, IN), lambda i: (i, 0))]
    operands = [x]
    for w, b in zip(ws, bs[:4]):
        in_specs += [resident(w), resident(b)]
        operands += [w, b]
    in_specs += [resident(w5_col), resident(bs[4])]
    operands += [w5_col, bs[4]]

    # Lane-dense (1, batch_tile) output block: unmasked stores + dense DMA.
    out_specs = pl.BlockSpec((1, batch_tile), lambda i: (0, i))

    # Explicit VMEM budget: f32 activation slab + double-buffered x/out +
    # double-buffered weights, 2x headroom; clamped to [32, 48] MiB so the
    # big-tile win stays safe under v7x's 64 MiB physical VMEM.
    act_bytes = batch_tile * sum(_LAYER_SIZES) * 4
    io_bytes = 2 * (batch_tile * IN * x.dtype.itemsize + batch_tile * 4)
    param_bytes = sum(int(a.size) * a.dtype.itemsize for a in operands[1:])
    vmem_limit = min(max(2 * (act_bytes + io_bytes + 2 * param_bytes),
                         32 << 20), 48 << 20)

    # Advisory cost hint: this kernel is EUP(tanh)- / MXU-push-bound, not
    # HBM-bound.
    dims = (IN,) + _LAYER_SIZES
    flops = 2 * Bp * sum(a * b for a, b in zip(dims[:-1], dims[1:]))
    transcendentals = Bp * sum(_LAYER_SIZES[:-1])
    bytes_accessed = (int(x.size) * x.dtype.itemsize + Bp * 4
                      + grid * param_bytes)

    kernel = functools.partial(mlp_kernel, matmul_dtype=matmul_dtype,
                               act_dtype=act_dtype)

    # NOTE: on v7x, pltpu.CORE_PARALLEL on the batch axis would make the
    # 2-TensorCore sharding explicit; kept as "parallel" here for portability.
    out_t = pl.pallas_call(
        kernel,
        out_shape=jax.ShapeDtypeStruct((1, Bp), jnp.float32),
        grid_spec=pltpu.PrefetchScalarGridSpec(
            num_scalar_prefetch=0,
            grid=(grid,),
            in_specs=in_specs,
            out_specs=out_specs,
        ),
        compiler_params=pltpu.CompilerParams(
            dimension_semantics=("parallel",),
            vmem_limit_bytes=int(vmem_limit)),
        cost_estimate=pl.CostEstimate(
            flops=int(flops),
            transcendentals=int(transcendentals),
            bytes_accessed=int(bytes_accessed)),
    )(*operands)

    # (1, Bp) -> (B, 1); slice off batch padding (tiny, done by XLA).
    return out_t[:, :B].T


def init_params(key, input_size):
    """nn.Linear-style uniform(-1/sqrt(fan_in), +1/sqrt(fan_in)) init.

    Weights in PyTorch layout (out_features, in_features); biases (out,).
    """
    dims = (input_size,) + _LAYER_SIZES
    params = []
    for fan_in, fan_out in zip(dims[:-1], dims[1:]):
        key, kw, kb = jax.random.split(key, 3)
        bound = 1.0 / (fan_in ** 0.5)
        w = jax.random.uniform(kw, (fan_out, fan_in), jnp.float32, -bound, bound)
        b = jax.random.uniform(kb, (fan_out,), jnp.float32, -bound, bound)
        params.append((w, b))
    return params


def mlp_ref(x, params):
    h = x
    for i, (w, b) in enumerate(params):
        h = h @ w.T + b
        if i < len(params) - 1:
            h = jnp.tanh(h)
    return h


if __name__ == "__main__":
    key = jax.random.PRNGKey(0)
    key, kx1, kx2 = jax.random.split(key, 3)

    input_size = 16   # matches MLP(input_size=16, hidden_size=...) ctor arg
    params = init_params(key, input_size)

    # 1) Exact f32 path, tiny batch (grid=1; batch padded 8 -> 128 lanes).
    x_small = jax.random.normal(kx1, (8, input_size), jnp.float32)
    out_small = mlp_forward(x_small, params,
                            matmul_dtype=jnp.float32, act_dtype=jnp.float32)
    jax.block_until_ready(out_small)
    ref_small = mlp_ref(x_small, params)
    assert out_small.shape == (8, 1)
    assert jnp.allclose(out_small, ref_small, atol=1e-5, rtol=1e-5)

    # 2) Exact f32 path, multi-tile: B=200 padded to 256, tile=128, grid=2.
    x_big = jax.random.normal(kx2, (200, input_size), jnp.float32)
    out_big = mlp_forward(x_big, params, batch_tile=128,
                          matmul_dtype=jnp.float32, act_dtype=jnp.float32)
    jax.block_until_ready(out_big)
    ref_big = mlp_ref(x_big, params)
    assert out_big.shape == (200, 1)
    assert jnp.allclose(out_big, ref_big, atol=1e-5, rtol=1e-5)

    # 3) Default per-chip path: bf16 matmuls (f32 accumulation) everywhere,
    #    bf16 tanh on v6e/v7x, f32 tanh on v5e. ~1e-2 relative drift vs the
    #    f32 reference over 5 layers is intentional and within tolerance.
    out_auto = mlp_forward(x_big, params)
    jax.block_until_ready(out_auto)
    assert out_auto.shape == (200, 1)
    assert jnp.allclose(out_auto, ref_big, atol=5e-2, rtol=5e-2)

    print("KERNEL_OK")
</pallas_src>

<mosaic_0001>
module attributes {stable_mosaic.version = 11 : i64} {
  func.func @mlp_kernel(%arg0: i32, %arg1: memref<128x16xf32, #tpu.memory_space<vmem>>, %arg2: memref<256x16xf32, #tpu.memory_space<vmem>>, %arg3: memref<256x1xf32, #tpu.memory_space<vmem>>, %arg4: memref<128x256xf32, #tpu.memory_space<vmem>>, %arg5: memref<128x1xf32, #tpu.memory_space<vmem>>, %arg6: memref<64x128xf32, #tpu.memory_space<vmem>>, %arg7: memref<64x1xf32, #tpu.memory_space<vmem>>, %arg8: memref<32x64xf32, #tpu.memory_space<vmem>>, %arg9: memref<32x1xf32, #tpu.memory_space<vmem>>, %arg10: memref<32x1xf32, #tpu.memory_space<vmem>>, %arg11: memref<1x1xf32, #tpu.memory_space<vmem>>, %arg12: memref<1x128xf32, #tpu.memory_space<vmem>>) attributes {dimension_semantics = [#tpu.dimension_semantics<parallel>], iteration_bounds = array<i64: 1>, scalar_prefetch = 0 : i64, scratch_operands = 0 : i64, tpu.core_type = #tpu.core_type<tc>, window_params = [{transform_indices = @transform_0, window_bounds = array<i64: 128, 16>}, {pipeline_mode = #tpu.pipeline_mode<synchronous>, transform_indices = @transform_1, window_bounds = array<i64: 256, 16>}, {pipeline_mode = #tpu.pipeline_mode<synchronous>, transform_indices = @transform_2, window_bounds = array<i64: 256, 1>}, {pipeline_mode = #tpu.pipeline_mode<synchronous>, transform_indices = @transform_3, window_bounds = array<i64: 128, 256>}, {pipeline_mode = #tpu.pipeline_mode<synchronous>, transform_indices = @transform_4, window_bounds = array<i64: 128, 1>}, {pipeline_mode = #tpu.pipeline_mode<synchronous>, transform_indices = @transform_5, window_bounds = array<i64: 64, 128>}, {pipeline_mode = #tpu.pipeline_mode<synchronous>, transform_indices = @transform_6, window_bounds = array<i64: 64, 1>}, {pipeline_mode = #tpu.pipeline_mode<synchronous>, transform_indices = @transform_7, window_bounds = array<i64: 32, 64>}, {pipeline_mode = #tpu.pipeline_mode<synchronous>, transform_indices = @transform_8, window_bounds = array<i64: 32, 1>}, {pipeline_mode = #tpu.pipeline_mode<synchronous>, transform_indices = @transform_9, window_bounds = array<i64: 32, 1>}, {pipeline_mode = #tpu.pipeline_mode<synchronous>, transform_indices = @transform_10, window_bounds = array<i64: 1, 1>}, {transform_indices = @transform_11, window_bounds = array<i64: 1, 128>}]} {
    %c0 = arith.constant 0 : index
    %c0_0 = arith.constant 0 : index
    %0 = vector.load %arg1[%c0, %c0_0] : memref<128x16xf32, #tpu.memory_space<vmem>>, vector<128x16xf32>
    %c0_1 = arith.constant 0 : index
    %c0_2 = arith.constant 0 : index
    %1 = vector.load %arg2[%c0_1, %c0_2] : memref<256x16xf32, #tpu.memory_space<vmem>>, vector<256x16xf32>
    %cst = arith.constant dense<0.000000e+00> : vector<256x128xf32>
    %2 = tpu.matmul %1, %0, %cst {dimension_numbers = #tpu.dot_dimension_numbers<[1], [1], [0], [0], [0, 0, 1, 0], [], []>} : vector<256x16xf32>, vector<128x16xf32>, vector<256x128xf32> -> vector<256x128xf32>
    %c0_3 = arith.constant 0 : index
    %c0_4 = arith.constant 0 : index
    %3 = vector.load %arg3[%c0_3, %c0_4] : memref<256x1xf32, #tpu.memory_space<vmem>>, vector<256x1xf32>
    %4 = vector.broadcast %3 : vector<256x1xf32> to vector<256x128xf32>
    %5 = arith.addf %2, %4 : vector<256x128xf32>
    %6 = math.tanh %5 : vector<256x128xf32>
    %c0_5 = arith.constant 0 : index
    %c0_6 = arith.constant 0 : index
    %7 = vector.load %arg4[%c0_5, %c0_6] : memref<128x256xf32, #tpu.memory_space<vmem>>, vector<128x256xf32>
    %cst_7 = arith.constant dense<0.000000e+00> : vector<128x128xf32>
    %8 = tpu.matmul %7, %6, %cst_7 {dimension_numbers = #tpu.dot_dimension_numbers<[1], [0], [0], [1], [0, 0, 1, 1], [], []>} : vector<128x256xf32>, vector<256x128xf32>, vector<128x128xf32> -> vector<128x128xf32>
    %c0_8 = arith.constant 0 : index
    %c0_9 = arith.constant 0 : index
    %9 = vector.load %arg5[%c0_8, %c0_9] : memref<128x1xf32, #tpu.memory_space<vmem>>, vector<128x1xf32>
    %10 = vector.broadcast %9 : vector<128x1xf32> to vector<128x128xf32>
    %11 = arith.addf %8, %10 : vector<128x128xf32>
    %12 = math.tanh %11 : vector<128x128xf32>
    %c0_10 = arith.constant 0 : index
    %c0_11 = arith.constant 0 : index
    %13 = vector.load %arg6[%c0_10, %c0_11] : memref<64x128xf32, #tpu.memory_space<vmem>>, vector<64x128xf32>
    %cst_12 = arith.constant dense<0.000000e+00> : vector<64x128xf32>
    %14 = tpu.matmul %13, %12, %cst_12 {dimension_numbers = #tpu.dot_dimension_numbers<[1], [0], [0], [1], [0, 0, 1, 1], [], []>} : vector<64x128xf32>, vector<128x128xf32>, vector<64x128xf32> -> vector<64x128xf32>
    %c0_13 = arith.constant 0 : index
    %c0_14 = arith.constant 0 : index
    %15 = vector.load %arg7[%c0_13, %c0_14] : memref<64x1xf32, #tpu.memory_space<vmem>>, vector<64x1xf32>
    %16 = vector.broadcast %15 : vector<64x1xf32> to vector<64x128xf32>
    %17 = arith.addf %14, %16 : vector<64x128xf32>
    %18 = math.tanh %17 : vector<64x128xf32>
    %c0_15 = arith.constant 0 : index
    %c0_16 = arith.constant 0 : index
    %19 = vector.load %arg8[%c0_15, %c0_16] : memref<32x64xf32, #tpu.memory_space<vmem>>, vector<32x64xf32>
    %cst_17 = arith.constant dense<0.000000e+00> : vector<32x128xf32>
    %20 = tpu.matmul %19, %18, %cst_17 {dimension_numbers = #tpu.dot_dimension_numbers<[1], [0], [0], [1], [0, 0, 1, 1], [], []>} : vector<32x64xf32>, vector<64x128xf32>, vector<32x128xf32> -> vector<32x128xf32>
    %c0_18 = arith.constant 0 : index
    %c0_19 = arith.constant 0 : index
    %21 = vector.load %arg9[%c0_18, %c0_19] : memref<32x1xf32, #tpu.memory_space<vmem>>, vector<32x1xf32>
    %22 = vector.broadcast %21 : vector<32x1xf32> to vector<32x128xf32>
    %23 = arith.addf %20, %22 : vector<32x128xf32>
    %24 = math.tanh %23 : vector<32x128xf32>
    %c0_20 = arith.constant 0 : index
    %c0_21 = arith.constant 0 : index
    %25 = vector.load %arg10[%c0_20, %c0_21] : memref<32x1xf32, #tpu.memory_space<vmem>>, vector<32x1xf32>
    %26 = vector.broadcast %25 : vector<32x1xf32> to vector<32x128xf32>
    %27 = arith.mulf %26, %24 : vector<32x128xf32>
    %cst_22 = arith.constant dense<0.000000e+00> : vector<128xf32>
    %28 = vector.multi_reduction <add>, %27, %cst_22 [0] : vector<32x128xf32> to vector<128xf32>
    %29 = vector.shape_cast %28 : vector<128xf32> to vector<1x128xf32>
    %c0_23 = arith.constant 0 : index
    %c0_24 = arith.constant 0 : index
    %30 = vector.load %arg11[%c0_23, %c0_24] : memref<1x1xf32, #tpu.memory_space<vmem>>, vector<1x1xf32>
    %31 = vector.broadcast %30 : vector<1x1xf32> to vector<1x128xf32>
    %32 = arith.addf %29, %31 : vector<1x128xf32>
    %c0_25 = arith.constant 0 : index
    %c0_26 = arith.constant 0 : index
    %33 = vector.load %arg12[%c0_25, %c0_26] : memref<1x128xf32, #tpu.memory_space<vmem>>, vector<1x128xf32>
    tpu.vector_store %arg12[%c0_25, %c0_26], %32 {strides = array<i32>} : memref<1x128xf32, #tpu.memory_space<vmem>>, vector<1x128xf32>,
    return
  }
  func.func @transform_0(%arg0: i32) -> (i32, i32) {
    %c0_i32 = arith.constant 0 : i32
    %c0_i32_0 = arith.constant 0 : i32
    return %arg0, %c0_i32 : i32, i32
  }
  func.func @transform_1(%arg0: i32) -> (i32, i32) {
    %c0_i32 = arith.constant 0 : i32
    %c0_i32_0 = arith.constant 0 : i32
    %c0_i32_1 = arith.constant 0 : i32
    return %c0_i32, %c0_i32_0 : i32, i32
  }
  func.func @transform_2(%arg0: i32) -> (i32, i32) {
    %c0_i32 = arith.constant 0 : i32
    %c0_i32_0 = arith.constant 0 : i32
    %c0_i32_1 = arith.constant 0 : i32
    return %c0_i32, %c0_i32_0 : i32, i32
  }
  func.func @transform_3(%arg0: i32) -> (i32, i32) {
    %c0_i32 = arith.constant 0 : i32
    %c0_i32_0 = arith.constant 0 : i32
    %c0_i32_1 = arith.constant 0 : i32
    return %c0_i32, %c0_i32_0 : i32, i32
  }
  func.func @transform_4(%arg0: i32) -> (i32, i32) {
    %c0_i32 = arith.constant 0 : i32
    %c0_i32_0 = arith.constant 0 : i32
    %c0_i32_1 = arith.constant 0 : i32
    return %c0_i32, %c0_i32_0 : i32, i32
  }
  func.func @transform_5(%arg0: i32) -> (i32, i32) {
    %c0_i32 = arith.constant 0 : i32
    %c0_i32_0 = arith.constant 0 : i32
    %c0_i32_1 = arith.constant 0 : i32
    return %c0_i32, %c0_i32_0 : i32, i32
  }
  func.func @transform_6(%arg0: i32) -> (i32, i32) {
    %c0_i32 = arith.constant 0 : i32
    %c0_i32_0 = arith.constant 0 : i32
    %c0_i32_1 = arith.constant 0 : i32
    return %c0_i32, %c0_i32_0 : i32, i32
  }
  func.func @transform_7(%arg0: i32) -> (i32, i32) {
    %c0_i32 = arith.constant 0 : i32
    %c0_i32_0 = arith.constant 0 : i32
    %c0_i32_1 = arith.constant 0 : i32
    return %c0_i32, %c0_i32_0 : i32, i32
  }
  func.func @transform_8(%arg0: i32) -> (i32, i32) {
    %c0_i32 = arith.constant 0 : i32
    %c0_i32_0 = arith.constant 0 : i32
    %c0_i32_1 = arith.constant 0 : i32
    return %c0_i32, %c0_i32_0 : i32, i32
  }
  func.func @transform_9(%arg0: i32) -> (i32, i32) {
    %c0_i32 = arith.constant 0 : i32
    %c0_i32_0 = arith.constant 0 : i32
    %c0_i32_1 = arith.constant 0 : i32
    return %c0_i32, %c0_i32_0 : i32, i32
  }
  func.func @transform_10(%arg0: i32) -> (i32, i32) {
    %c0_i32 = arith.constant 0 : i32
    %c0_i32_0 = arith.constant 0 : i32
    %c0_i32_1 = arith.constant 0 : i32
    return %c0_i32, %c0_i32_0 : i32, i32
  }
  func.func @transform_11(%arg0: i32) -> (i32, i32) {
    %c0_i32 = arith.constant 0 : i32
    %c0_i32_0 = arith.constant 0 : i32
    return %c0_i32, %arg0 : i32, i32
  }
}

</mosaic_0001>

<bundles_post_ra>
// kernel: tpu_custom_call.1
= control target key start
LH: loop header
LB: loop body
LE: loop exit
PB: predicated region body
PF: predicated region fallthrough
CT: control target
= control target key end

     0   :  { %s2711_s0 = inlined_call_operand.vmem [shape: f32[128,16], index: 0, kind: input, shape index: {}]   ;;  %s2712_s1 = inlined_call_operand.vmem [shape: f32[256,16], index: 1, kind: input, shape index: {}]   ;;  %s2713_s2 = inlined_call_operand.vmem [shape: f32[256,1], index: 2, kind: input, shape index: {}]   ;;  %s2714_s3 = inlined_call_operand.vmem [shape: f32[128,256], index: 3, kind: input, shape index: {}]   ;;  %s2715_s4 = inlined_call_operand.vmem [shape: f32[128,1], index: 4, kind: input, shape index: {}]   ;;  %s2716_s5 = inlined_call_operand.vmem [shape: f32[64,128], index: 5, kind: input, shape index: {}]   ;;  %s2717_s6 = inlined_call_operand.vmem [shape: f32[64,1], index: 6, kind: input, shape index: {}]   ;;  %s2718_s7 = inlined_call_operand.vmem [shape: f32[32,64], index: 7, kind: input, shape index: {}]   ;;  %s2719_s8 = inlined_call_operand.vmem [shape: f32[32,1], index: 8, kind: input, shape index: {}]   ;;  %s2720_s9 = inlined_call_operand.vmem [shape: f32[32,1], index: 9, kind: input, shape index: {}]   ;;  %s2721_s10 = inlined_call_operand.<no memory space> [shape: f32[1,1], index: 10, kind: input, shape index: {}]   ;;  %s2722_s11 = inlined_call_operand.hbm [shape: f32[1,128], index: 11, kind: output, shape index: {}]  }
   0x1   :  { %v16_v0 = vstv %s2721_s10 }
   0x2   :  { %17 = vst [vmem:[#allocation2] sm:$0x1] %v16_v0 }
   0x3   :  { %v41_v1 = vld [vmem:[%s2711_s0] sm:$0xff]  ;;  %v42_v2 = vld [vmem:[%s2711_s0 + $0x8] sm:$0xff]  ;;  %vm281_vm0 = vcmask 130048   ;;  %v43_v3 = vld [vmem:[%s2711_s0 + $0x10] sm:$0xff]  ;;  %v1972_v7 = vmov 0  }
   0x4   :  { %v1696_v4 = vpack.c.bf16 %v42_v2, %v41_v1  ;;  %vm2048_vm1 = vmpackc.low %vm281_vm0, %vm281_vm0  ;;  %v44_v6 = vld [vmem:[%s2711_s0 + $0x18] sm:$0xff]  ;;  %1826 = vset.pattern.permute.xlu0 %v1972_v7  ;;  %1827 = vset.pattern.permute.xlu1 %v1972_v7  ;;  %v105_v9 = vld [vmem:[%s2713_s2 + $0x80] sm:$0xff] }
   0x5   :  { %v1702_v8 = vpack.c.bf16 %v44_v6, %v43_v3  ;;  %203 = vperm.xlu0 %1826, %v105_v9   ;;  %v89_v10 = vld [vmem:[%s2713_s2] sm:$0xff]  ;;  %v106_v11 = vld [vmem:[%s2713_s2 + $0x88] sm:$0xff]  ;;  %v107_v15 = vld [vmem:[%s2713_s2 + $0x90] sm:$0xff] }
   0x6   :  { %1698 = vmatprep.subr.msk.bf16.mxu0 %vm2048_vm1, %v1696_v4  ;;  %123 = vperm.xlu1 %1827, %v89_v10   ;;  %v90_v12 = vld [vmem:[%s2713_s2 + $0x8] sm:$0xff]  ;;  %v45_v13 = vld [vmem:[%s2711_s0 + $0x20] sm:$0xff]  ;;  %v108_v17 = vld [vmem:[%s2713_s2 + $0x98] sm:$0xff] }
   0x7   :  { %1701 = vmatpush3.bf16.xpose.msk.msra.mxu0 %vm2048_vm1, %v1696_v4  ;;  %v46_v14 = vld [vmem:[%s2711_s0 + $0x28] sm:$0xff]  ;;  %v91_v18 = vld [vmem:[%s2713_s2 + $0x10] sm:$0xff]  ;;  %v57_v19 = vld [vmem:[%s2712_s1] sm:$0xff] }
   0x8   :  { %1704 = vmatprep.subr.msk.bf16.mxu0 %vm2048_vm1, %v1702_v8  ;;  %v1708_v16 = vpack.c.bf16 %v46_v14, %v45_v13  ;;  %v92_v20 = vld [vmem:[%s2713_s2 + $0x18] sm:$0xff]  ;;  %1582 = vmatprep.mubr.msk.f32.mxu0 %vm281_vm0, %v57_v19  ;;  %v47_v21 = vld [vmem:[%s2711_s0 + $0x30] sm:$0xff]  ;;  %v109_v23 = vld [vmem:[%s2713_s2 + $0xa0] sm:$0xff] }
   0x9   :  { %208 = vperm.xlu0 %1826, %v106_v11   ;;  %v48_v22 = vld [vmem:[%s2711_s0 + $0x38] sm:$0xff]  ;;  %v110_v25 = vld [vmem:[%s2713_s2 + $0xa8] sm:$0xff]  ;;  %v93_v26 = vld [vmem:[%s2713_s2 + $0x20] sm:$0xff] }
   0xa   :  { %128 = vperm.xlu1 %1827, %v90_v12   ;;  %v1714_v24 = vpack.c.bf16 %v48_v22, %v47_v21  ;;  %v94_v27 = vld [vmem:[%s2713_s2 + $0x28] sm:$0xff]  ;;  %v49_v28 = vld [vmem:[%s2711_s0 + $0x40] sm:$0xff]  ;;  %v111_v30 = vld [vmem:[%s2713_s2 + $0xb0] sm:$0xff] }
   0xb   :  { %v50_v29 = vld [vmem:[%s2711_s0 + $0x48] sm:$0xff]  ;;  %v112_v32 = vld [vmem:[%s2713_s2 + $0xb8] sm:$0xff]  ;;  %v95_v33 = vld [vmem:[%s2713_s2 + $0x30] sm:$0xff] }
   0xc   :  { %v1720_v31 = vpack.c.bf16 %v50_v29, %v49_v28  ;;  %v96_v34 = vld [vmem:[%s2713_s2 + $0x38] sm:$0xff]  ;;  %v51_v35 = vld [vmem:[%s2711_s0 + $0x50] sm:$0xff]  ;;  %v113_v37 = vld [vmem:[%s2713_s2 + $0xc0] sm:$0xff] }
   0xd   :  { %213 = vperm.xlu0 %1826, %v107_v15   ;;  %v52_v36 = vld [vmem:[%s2711_s0 + $0x58] sm:$0xff]  ;;  %v114_v39 = vld [vmem:[%s2713_s2 + $0xc8] sm:$0xff]  ;;  %v97_v40 = vld [vmem:[%s2713_s2 + $0x40] sm:$0xff] }
   0xe   :  { %218 = vperm.xlu1 %1827, %v108_v17   ;;  %v1726_v38 = vpack.c.bf16 %v52_v36, %v51_v35  ;;  %v98_v41 = vld [vmem:[%s2713_s2 + $0x48] sm:$0xff]  ;;  %v53_v42 = vld [vmem:[%s2711_s0 + $0x60] sm:$0xff] }
   0xf   :  { %1707 = vmatpush3.bf16.xpose.msk.msra.mxu0 %vm2048_vm1, %v1702_v8  ;;  %v54_v43 = vld [vmem:[%s2711_s0 + $0x68] sm:$0xff] }
  0x10   :  { %1710 = vmatprep.subr.msk.bf16.mxu0 %vm2048_vm1, %v1708_v16 }
  0x11   :  { %133 = vperm.xlu0 %1826, %v91_v18  }
  0x12   :  { %138 = vperm.xlu1 %1827, %v92_v20  }
  0x15   :  { %223 = vperm.xlu0 %1826, %v109_v23  }
  0x16   :  { %228 = vperm.xlu1 %1827, %v110_v25  }
  0x17   :  { %1713 = vmatpush3.bf16.xpose.msk.msra.mxu0 %vm2048_vm1, %v1708_v16 }
  0x18   :  { %1716 = vmatprep.subr.msk.bf16.mxu0 %vm2048_vm1, %v1714_v24 }
  0x19   :  { %143 = vperm.xlu0 %1826, %v93_v26  }
  0x1a   :  { %148 = vperm.xlu1 %1827, %v94_v27  }
  0x1d   :  { %233 = vperm.xlu0 %1826, %v111_v30  }
  0x1e   :  { %238 = vperm.xlu1 %1827, %v112_v32  }
  0x1f   :  { %1719 = vmatpush3.bf16.xpose.msk.msra.mxu0 %vm2048_vm1, %v1714_v24 }
  0x20   :  { %1722 = vmatprep.subr.msk.bf16.mxu0 %vm2048_vm1, %v1720_v31 }
  0x21   :  { %153 = vperm.xlu0 %1826, %v95_v33  }
  0x22   :  { %158 = vperm.xlu1 %1827, %v96_v34  }
  0x25   :  { %243 = vperm.xlu0 %1826, %v113_v37  }
  0x26   :  { %248 = vperm.xlu1 %1827, %v114_v39  }
  0x27   :  { %1725 = vmatpush3.bf16.xpose.msk.msra.mxu0 %vm2048_vm1, %v1720_v31 }
  0x28   :  { %1728 = vmatprep.subr.msk.bf16.mxu0 %vm2048_vm1, %v1726_v38 }
  0x29   :  { %18 = vsyncpa [#allocation4], 0  ;;  %163 = vperm.xlu0 %1826, %v97_v40   ;;  %v115_v44 = vld [vmem:[%s2713_s2 + $0xd0] sm:$0xff]  ;;  %v1732_v45 = vpack.c.bf16 %v54_v43, %v53_v42  ;;  %v116_v46 = vld [vmem:[%s2713_s2 + $0xd8] sm:$0xff]  ;;  %vm1169_vm2 = vcmask 523264  }
  0x2a   :  { %168 = vperm.xlu1 %1827, %v98_v41   ;;  %v99_v47 = vld [vmem:[%s2713_s2 + $0x50] sm:$0xff]  ;;  %v100_v48 = vld [vmem:[%s2713_s2 + $0x58] sm:$0xff]  ;;  %v117_v51 = vld [vmem:[%s2713_s2 + $0xe0] sm:$0xff] }
  0x2b   :  { %v55_v49 = vld [vmem:[%s2711_s0 + $0x70] sm:$0xff]  ;;  %v56_v50 = vld [vmem:[%s2711_s0 + $0x78] sm:$0xff]  ;;  %v118_v53 = vld [vmem:[%s2713_s2 + $0xe8] sm:$0xff] }
  0x2c   :  { %v1738_v52 = vpack.c.bf16 %v56_v50, %v55_v49  ;;  %v101_v54 = vld [vmem:[%s2713_s2 + $0x60] sm:$0xff]  ;;  %v102_v55 = vld [vmem:[%s2713_s2 + $0x68] sm:$0xff]  ;;  %v119_v56 = vld [vmem:[%s2713_s2 + $0xf0] sm:$0xff] }
  0x2d   :  { %253 = vperm.xlu0 %1826, %v115_v44   ;;  %v120_v57 = vld [vmem:[%s2713_s2 + $0xf8] sm:$0xff]  ;;  %v103_v58 = vld [vmem:[%s2713_s2 + $0x70] sm:$0xff]  ;;  %v58_v60 = vld [vmem:[%s2712_s1 + $0x8] sm:$0xff] }
  0x2e   :  { %258 = vperm.xlu1 %1827, %v116_v46   ;;  %v104_v59 = vld [vmem:[%s2713_s2 + $0x78] sm:$0xff]  ;;  %v715_v61 = vld [vmem:[%s2715_s4] sm:$0xff]  ;;  %v59_v62 = vld [vmem:[%s2712_s1 + $0x10] sm:$0xff] }
  0x2f   :  { %1731 = vmatpush3.bf16.xpose.msk.msra.mxu0 %vm2048_vm1, %v1726_v38  ;;  %v716_v63 = vld [vmem:[%s2715_s4 + $0x8] sm:$0xff]  ;;  %v60_v0 = vld [vmem:[%s2712_s1 + $0x18] sm:$0xff]  ;;  %v717_v1 = vld [vmem:[%s2715_s4 + $0x10] sm:$0xff] }
  0x30   :  { %1734 = vmatprep.subr.msk.bf16.mxu0 %vm2048_vm1, %v1732_v45  ;;  %v61_v2 = vld [vmem:[%s2712_s1 + $0x20] sm:$0xff]  ;;  %v718_v3 = vld [vmem:[%s2715_s4 + $0x18] sm:$0xff]  ;;  %v62_v4 = vld [vmem:[%s2712_s1 + $0x28] sm:$0xff] }
  0x31   :  { %173 = vperm.xlu0 %1826, %v99_v47   ;;  %v719_v5 = vld [vmem:[%s2715_s4 + $0x20] sm:$0xff]  ;;  %v63_v6 = vld [vmem:[%s2712_s1 + $0x30] sm:$0xff]  ;;  %v720_v7 = vld [vmem:[%s2715_s4 + $0x28] sm:$0xff] }
  0x32   :  { %178 = vperm.xlu1 %1827, %v100_v48   ;;  %v64_v8 = vld [vmem:[%s2712_s1 + $0x38] sm:$0xff]  ;;  %v721_v9 = vld [vmem:[%s2715_s4 + $0x30] sm:$0xff]  ;;  %v65_v10 = vld [vmem:[%s2712_s1 + $0x40] sm:$0xff] }
  0x33   :  { %v722_v11 = vld [vmem:[%s2715_s4 + $0x38] sm:$0xff]  ;;  %v66_v12 = vld [vmem:[%s2712_s1 + $0x48] sm:$0xff]  ;;  %v723_v13 = vld [vmem:[%s2715_s4 + $0x40] sm:$0xff] }
  0x34   :  { %v67_v14 = vld [vmem:[%s2712_s1 + $0x50] sm:$0xff]  ;;  %v724_v15 = vld [vmem:[%s2715_s4 + $0x48] sm:$0xff]  ;;  %v68_v16 = vld [vmem:[%s2712_s1 + $0x58] sm:$0xff] }
  0x35   :  { %263 = vperm.xlu0 %1826, %v117_v51   ;;  %v725_v17 = vld [vmem:[%s2715_s4 + $0x50] sm:$0xff]  ;;  %v69_v18 = vld [vmem:[%s2712_s1 + $0x60] sm:$0xff]  ;;  %v726_v19 = vld [vmem:[%s2715_s4 + $0x58] sm:$0xff] }
  0x36   :  { %268 = vperm.xlu1 %1827, %v118_v53   ;;  %v70_v20 = vld [vmem:[%s2712_s1 + $0x68] sm:$0xff]  ;;  %v727_v21 = vld [vmem:[%s2715_s4 + $0x60] sm:$0xff]  ;;  %v71_v22 = vld [vmem:[%s2712_s1 + $0x70] sm:$0xff] }
  0x37   :  { %1737 = vmatpush3.bf16.xpose.msk.msra.mxu0 %vm2048_vm1, %v1732_v45  ;;  %v728_v23 = vld [vmem:[%s2715_s4 + $0x68] sm:$0xff]  ;;  %v72_v24 = vld [vmem:[%s2712_s1 + $0x78] sm:$0xff]  ;;  %v729_v25 = vld [vmem:[%s2715_s4 + $0x70] sm:$0xff] }
  0x38   :  { %1740 = vmatprep.subr.msk.bf16.mxu0 %vm2048_vm1, %v1738_v52  ;;  %v73_v26 = vld [vmem:[%s2712_s1 + $0x80] sm:$0xff]  ;;  %v730_v27 = vld [vmem:[%s2715_s4 + $0x78] sm:$0xff]  ;;  %v74_v28 = vld [vmem:[%s2712_s1 + $0x88] sm:$0xff] }
  0x39   :  { %183 = vperm.xlu0 %1826, %v101_v54   ;;  %v980_v29 = vld [vmem:[%s2717_s6] sm:$0xff]  ;;  %v75_v30 = vld [vmem:[%s2712_s1 + $0x90] sm:$0xff]  ;;  %v981_v31 = vld [vmem:[%s2717_s6 + $0x8] sm:$0xff] }
  0x3a   :  { %188 = vperm.xlu1 %1827, %v102_v55   ;;  %v76_v32 = vld [vmem:[%s2712_s1 + $0x98] sm:$0xff]  ;;  %v982_v33 = vld [vmem:[%s2717_s6 + $0x10] sm:$0xff]  ;;  %v77_v34 = vld [vmem:[%s2712_s1 + $0xa0] sm:$0xff] }
  0x3b   :  { %v983_v35 = vld [vmem:[%s2717_s6 + $0x18] sm:$0xff]  ;;  %v78_v36 = vld [vmem:[%s2712_s1 + $0xa8] sm:$0xff]  ;;  %v984_v37 = vld [vmem:[%s2717_s6 + $0x20] sm:$0xff] }
  0x3c   :  { %v79_v38 = vld [vmem:[%s2712_s1 + $0xb0] sm:$0xff]  ;;  %v985_v39 = vld [vmem:[%s2717_s6 + $0x28] sm:$0xff]  ;;  %v80_v40 = vld [vmem:[%s2712_s1 + $0xb8] sm:$0xff] }
  0x3d   :  { %273 = vperm.xlu0 %1826, %v119_v56   ;;  %v986_v41 = vld [vmem:[%s2717_s6 + $0x30] sm:$0xff]  ;;  %v81_v42 = vld [vmem:[%s2712_s1 + $0xc0] sm:$0xff]  ;;  %v987_v43 = vld [vmem:[%s2717_s6 + $0x38] sm:$0xff] }
  0x3e   :  { %278 = vperm.xlu1 %1827, %v120_v57   ;;  %v82_v44 = vld [vmem:[%s2712_s1 + $0xc8] sm:$0xff]  ;;  %v1145_v45 = vld [vmem:[%s2719_s8] sm:$0xff]  ;;  %v83_v46 = vld [vmem:[%s2712_s1 + $0xd0] sm:$0xff] }
  0x3f   :  { %1743 = vmatpush3.bf16.xpose.msk.msra.mxu0 %vm2048_vm1, %v1738_v52  ;;  %v1146_v47 = vld [vmem:[%s2719_s8 + $0x8] sm:$0xff]  ;;  %v84_v48 = vld [vmem:[%s2712_s1 + $0xd8] sm:$0xff]  ;;  %v1147_v49 = vld [vmem:[%s2719_s8 + $0x10] sm:$0xff] }
  0x40   :  { %v85_v50 = vld [vmem:[%s2712_s1 + $0xe0] sm:$0xff]  ;;  %v1148_v51 = vld [vmem:[%s2719_s8 + $0x18] sm:$0xff]  ;;  %v86_v52 = vld [vmem:[%s2712_s1 + $0xe8] sm:$0xff] }
  0x41   :  { %193 = vperm.xlu0 %1826, %v103_v58   ;;  %v1271_v53 = vld [vmem:[%s2720_s9] sm:$0xff]  ;;  %v87_v54 = vld [vmem:[%s2712_s1 + $0xf0] sm:$0xff]  ;;  %v1272_v55 = vld [vmem:[%s2720_s9 + $0x8] sm:$0xff] }
  0x42   :  { %198 = vperm.xlu1 %1827, %v104_v59   ;;  %v88_v56 = vld [vmem:[%s2712_s1 + $0xf8] sm:$0xff]  ;;  %v1273_v57 = vld [vmem:[%s2720_s9 + $0x10] sm:$0xff]  ;;  %v1308_v59 = vld [vmem:[#allocation2] sm:$0x1] }
  0x43   :  { %v1274_v58 = vld [vmem:[%s2720_s9 + $0x18] sm:$0xff] }
  0x45   :  { %733 = vperm.xlu0 %1826, %v715_v61  }
  0x46   :  { %1583 = vmatmul.mubr.msk.f32.vlgmr.msra.gmra.mrb[0].mxu0 %vm281_vm0, %v58_v60  ;;  %738 = vperm.xlu1 %1827, %v716_v63  }
  0x47   :  { %1585 = vmatprep.mubr.msk.f32.mxu0 %vm281_vm0, %v59_v62 }
  0x49   :  { %743 = vperm.xlu0 %1826, %v717_v1   ;;  %v684_v1 = vld [vmem:[%s2714_s3 + $0x8] sm:$0xff] }
  0x4a   :  { %1586 = vmatmul.mubr.msk.f32.gmra.mrb[2].mxu0 %vm281_vm0, %v60_v0  ;;  %748 = vperm.xlu1 %1827, %v718_v3  }
  0x4b   :  { %1588 = vmatprep.mubr.msk.f32.mxu0 %vm281_vm0, %v61_v2  ;;  %875 = vmatprep.mubr.f32.mxu1 %v684_v1 }
  0x4d   :  { %753 = vperm.xlu0 %1826, %v719_v5  }
  0x4e   :  { %1589 = vmatmul.mubr.msk.f32.gmra.mrb[4].mxu0 %vm281_vm0, %v62_v4  ;;  %758 = vperm.xlu1 %1827, %v720_v7  }
  0x4f   :  { %1591 = vmatprep.mubr.msk.f32.mxu0 %vm281_vm0, %v63_v6 }
  0x51   :  { %763 = vperm.xlu0 %1826, %v721_v9  }
  0x52   :  { %1592 = vmatmul.mubr.msk.f32.gmra.mrb[6].mxu0 %vm281_vm0, %v64_v8  ;;  %768 = vperm.xlu1 %1827, %v722_v11  }
  0x53   :  { %1594 = vmatprep.mubr.msk.f32.mxu0 %vm281_vm0, %v65_v10 }
  0x55   :  { %773 = vperm.xlu0 %1826, %v723_v13  }
  0x56   :  { %1595 = vmatmul.mubr.msk.f32.gmra.mrb[8].mxu0 %vm281_vm0, %v66_v12  ;;  %778 = vperm.xlu1 %1827, %v724_v15  }
  0x57   :  { %1597 = vmatprep.mubr.msk.f32.mxu0 %vm281_vm0, %v67_v14 }
  0x59   :  { %783 = vperm.xlu0 %1826, %v725_v17  }
  0x5a   :  { %1598 = vmatmul.mubr.msk.f32.gmra.mrb[10].mxu0 %vm281_vm0, %v68_v16  ;;  %788 = vperm.xlu1 %1827, %v726_v19  }
  0x5b   :  { %1600 = vmatprep.mubr.msk.f32.mxu0 %vm281_vm0, %v69_v18 }
  0x5d   :  { %793 = vperm.xlu0 %1826, %v727_v21  }
  0x5e   :  { %1601 = vmatmul.mubr.msk.f32.gmra.mrb[12].mxu0 %vm281_vm0, %v70_v20  ;;  %798 = vperm.xlu1 %1827, %v728_v23  }
  0x5f   :  { %1603 = vmatprep.mubr.msk.f32.mxu0 %vm281_vm0, %v71_v22 }
  0x61   :  { %803 = vperm.xlu0 %1826, %v729_v25  }
  0x62   :  { %1604 = vmatmul.mubr.msk.f32.gmra.mrb[14].mxu0 %vm281_vm0, %v72_v24  ;;  %808 = vperm.xlu1 %1827, %v730_v27  }
  0x63   :  { %1606 = vmatprep.mubr.msk.f32.mxu0 %vm281_vm0, %v73_v26 }
  0x65   :  { %990 = vperm.xlu0 %1826, %v980_v29  }
  0x66   :  { %1607 = vmatmul.mubr.msk.f32.gmra.mrb[16].mxu0 %vm281_vm0, %v74_v28  ;;  %995 = vperm.xlu1 %1827, %v981_v31  }
  0x67   :  { %1609 = vmatprep.mubr.msk.f32.mxu0 %vm281_vm0, %v75_v30 }
  0x69   :  { %1000 = vperm.xlu0 %1826, %v982_v33  }
  0x6a   :  { %1610 = vmatmul.mubr.msk.f32.gmra.mrb[18].mxu0 %vm281_vm0, %v76_v32  ;;  %1005 = vperm.xlu1 %1827, %v983_v35  }
  0x6b   :  { %1612 = vmatprep.mubr.msk.f32.mxu0 %vm281_vm0, %v77_v34 }
  0x6d   :  { %1010 = vperm.xlu0 %1826, %v984_v37  }
  0x6e   :  { %1613 = vmatmul.mubr.msk.f32.gmra.mrb[20].mxu0 %vm281_vm0, %v78_v36  ;;  %1015 = vperm.xlu1 %1827, %v985_v39  }
  0x6f   :  { %1615 = vmatprep.mubr.msk.f32.mxu0 %vm281_vm0, %v79_v38 }
  0x71   :  { %1020 = vperm.xlu0 %1826, %v986_v41  }
  0x72   :  { %1616 = vmatmul.mubr.msk.f32.gmra.mrb[22].mxu0 %vm281_vm0, %v80_v40  ;;  %1025 = vperm.xlu1 %1827, %v987_v43  }
  0x73   :  { %1618 = vmatprep.mubr.msk.f32.mxu0 %vm281_vm0, %v81_v42 }
  0x75   :  { %1151 = vperm.xlu0 %1826, %v1145_v45  }
  0x76   :  { %1619 = vmatmul.mubr.msk.f32.gmra.mrb[24].mxu0 %vm281_vm0, %v82_v44  ;;  %1156 = vperm.xlu1 %1827, %v1146_v47  }
  0x77   :  { %1621 = vmatprep.mubr.msk.f32.mxu0 %vm281_vm0, %v83_v46 }
  0x79   :  { %1161 = vperm.xlu0 %1826, %v1147_v49  }
  0x7a   :  { %1622 = vmatmul.mubr.msk.f32.gmra.mrb[26].mxu0 %vm281_vm0, %v84_v48  ;;  %1166 = vperm.xlu1 %1827, %v1148_v51  }
  0x7b   :  { %1624 = vmatprep.mubr.msk.f32.mxu0 %vm281_vm0, %v85_v50 }
  0x7d   :  { %1277 = vperm.xlu0 %1826, %v1271_v53  }
  0x7e   :  { %1625 = vmatmul.mubr.msk.f32.gmra.mrb[28].mxu0 %vm281_vm0, %v86_v52  ;;  %1282 = vperm.xlu1 %1827, %v1272_v55  }
  0x7f   :  { %1627 = vmatprep.mubr.msk.f32.mxu0 %vm281_vm0, %v87_v54 }
  0x81   :  { %1287 = vperm.xlu0 %1826, %v1273_v57  }
  0x82   :  { %1628 = vmatmul.mubr.msk.f32.gmra.mrb[30].mxu0 %vm281_vm0, %v88_v56  ;;  %1292 = vperm.xlu1 %1827, %v1274_v58  }
  0x84   :  { %v2443_v61 = vpop.permute.xlu0 %203 }
  0x85   :  { %1311 = vperm.xlu0 %1826, %v1308_v59   ;;  %v124_v60 = vpop.permute.xlu1 %123 }
  0x88   :  { %v2445_v63 = vpop.permute.xlu0 %208 }
  0x89   :  { %v129_v62 = vpop.permute.xlu1 %128 }
  0x8c   :  { %v2452_v2 = vpop.permute.xlu0 %213 }
  0x8d   :  { %v2447_v0 = vpop.permute.xlu1 %218 }
  0x90   :  { %v134_v4 = vpop.permute.xlu0 %133 }
  0x91   :  { %v139_v3 = vpop.permute.xlu1 %138 }
  0x94   :  { %v2456_v6 = vpop.permute.xlu0 %223 }
  0x95   :  { %v2454_v5 = vpop.permute.xlu1 %228 }
  0x98   :  { %v144_v8 = vpop.permute.xlu0 %143 }
  0x99   :  { %v149_v7 = vpop.permute.xlu1 %148 }
  0x9c   :  { %v2460_v10 = vpop.permute.xlu0 %233 }
  0x9d   :  { %v2458_v9 = vpop.permute.xlu1 %238 }
  0xa0   :  { %v154_v12 = vpop.permute.xlu0 %153 }
  0xa1   :  { %v159_v11 = vpop.permute.xlu1 %158 }
  0xa4   :  { %v2464_v14 = vpop.permute.xlu0 %243 }
  0xa5   :  { %v2462_v13 = vpop.permute.xlu1 %248 }
  0xa8   :  { %v164_v16 = vpop.permute.xlu0 %163 }
  0xa9   :  { %v169_v15 = vpop.permute.xlu1 %168 }
  0xac   :  { %v2468_v18 = vpop.permute.xlu0 %253 }
  0xad   :  { %v2466_v17 = vpop.permute.xlu1 %258 }
  0xb0   :  { %v174_v25 = vpop.permute.xlu0 %173 }
  0xb1   :  { %v179_v23 = vpop.permute.xlu1 %178 }
  0xb4   :  { %v2472_v34 = vpop.permute.xlu0 %263 }
  0xb5   :  { %v2470_v32 = vpop.permute.xlu1 %268 }
  0xb8   :  { %v184_v45 = vpop.permute.xlu0 %183 }
  0xb9   :  { %v189_v42 = vpop.permute.xlu1 %188 }
  0xbc   :  { %v2492_v58 = vpop.permute.xlu0 %273 }
  0xbd   :  { %v2490_v56 = vpop.permute.xlu1 %278 }
 0x119   :  { %v1584_v19 = vpop.f32.mrb[0].mxu0 }
 0x11a   :  { %v498_v20 = vadd.f32 %v1584_v19, %v129_v62  ;;  %v492_v21 = vpop.f32.mrb[1].mxu0 }
 0x11b   :  { %v493_v22 = vadd.f32 %v492_v21, %v124_v60 }
 0x11c   :  { %1828 = vtanh.f32 %v498_v20 }
 0x11d   :  { %1830 = vtanh.f32 %v493_v22  ;;  %v1587_v24 = vpop.f32.mrb[2].mxu0 }
 0x11e   :  { %v508_v26 = vadd.f32 %v1587_v24, %v139_v3  ;;  %v502_v27 = vpop.f32.mrb[3].mxu0 }
 0x11f   :  { %v503_v28 = vadd.f32 %v502_v27, %v134_v4 }
 0x120   :  { %1832 = vtanh.f32 %v508_v26 }
 0x121   :  { %1834 = vtanh.f32 %v503_v28  ;;  %v1590_v29 = vpop.f32.mrb[4].mxu0 }
 0x122   :  { %v518_v30 = vadd.f32 %v1590_v29, %v149_v7  ;;  %v512_v31 = vpop.f32.mrb[5].mxu0 }
 0x123   :  { %v513_v33 = vadd.f32 %v512_v31, %v144_v8 }
 0x124   :  { %1836 = vtanh.f32 %v518_v30 }
 0x125   :  { %1838 = vtanh.f32 %v513_v33  ;;  %v1593_v35 = vpop.f32.mrb[6].mxu0 }
 0x126   :  { %v2474_v36 = vpop.eup %1828  ;;  %v528_v37 = vadd.f32 %v1593_v35, %v159_v11  ;;  %v522_v38 = vpop.f32.mrb[7].mxu0 }
 0x127   :  { %v2476_v39 = vpop.eup %1830  ;;  %v523_v40 = vadd.f32 %v522_v38, %v154_v12  ;;  %v199_v11 = vpop.permute.xlu1 %198 }
 0x128   :  { %1840 = vtanh.f32 %v528_v37  ;;  %v1746_v41 = vpack.c.bf16 %v2474_v36, %v2476_v39 }
 0x129   :  { %1842 = vtanh.f32 %v523_v40  ;;  %v1596_v43 = vpop.f32.mrb[8].mxu0 }
 0x12a   :  { %v2480_v44 = vpop.eup %1832  ;;  %v538_v46 = vadd.f32 %v1596_v43, %v169_v15  ;;  %v532_v47 = vpop.f32.mrb[9].mxu0 }
 0x12b   :  { %v2482_v48 = vpop.eup %1834  ;;  %v533_v49 = vadd.f32 %v532_v47, %v164_v16  ;;  %v194_v16 = vpop.permute.xlu0 %193 }
 0x12c   :  { %1844 = vtanh.f32 %v538_v46  ;;  %v1750_v50 = vpack.c.bf16 %v2480_v44, %v2482_v48 }
 0x12d   :  { %1846 = vtanh.f32 %v533_v49  ;;  %v1599_v51 = vpop.f32.mrb[10].mxu0 }
 0x12e   :  { %v2486_v52 = vpop.eup %1836  ;;  %v548_v53 = vadd.f32 %v1599_v51, %v179_v23  ;;  %v542_v54 = vpop.f32.mrb[11].mxu0 }
 0x12f   :  { %v2488_v55 = vpop.eup %1838  ;;  %v543_v57 = vadd.f32 %v542_v54, %v174_v25 }
 0x130   :  { %1848 = vtanh.f32 %v548_v53  ;;  %v1754_v59 = vpack.c.bf16 %v2486_v52, %v2488_v55 }
 0x131   :  { %1850 = vtanh.f32 %v543_v57  ;;  %v1602_v60 = vpop.f32.mrb[12].mxu0 }
 0x132   :  { %v2496_v62 = vpop.eup %1840  ;;  %v558_v1 = vadd.f32 %v1602_v60, %v189_v42  ;;  %v552_v3 = vpop.f32.mrb[13].mxu0 }
 0x133   :  { %v2498_v4 = vpop.eup %1842  ;;  %v553_v7 = vadd.f32 %v552_v3, %v184_v45 }
 0x134   :  { %1852 = vtanh.f32 %v558_v1  ;;  %v1758_v8 = vpack.c.bf16 %v2496_v62, %v2498_v4 }
 0x135   :  { %1854 = vtanh.f32 %v553_v7  ;;  %v1605_v12 = vpop.f32.mrb[14].mxu0 }
 0x136   :  { %v2502_v15 = vpop.eup %1844  ;;  %v568_v19 = vadd.f32 %v1605_v12, %v199_v11  ;;  %v562_v20 = vpop.f32.mrb[15].mxu0 }
 0x137   :  { %v2504_v21 = vpop.eup %1846  ;;  %v563_v22 = vadd.f32 %v562_v20, %v194_v16 }
 0x138   :  { %1856 = vtanh.f32 %v568_v19  ;;  %v1762_v23 = vpack.c.bf16 %v2502_v15, %v2504_v21  ;;  %v683_v15 = vld [vmem:[%s2714_s3] sm:$0xff]  ;;  %v686_v21 = vld [vmem:[%s2714_s3 + $0x18] sm:$0xff] }
 0x139   :  { %1858 = vtanh.f32 %v563_v22  ;;  %v1608_v24 = vpop.f32.mrb[16].mxu0 }
 0x13a   :  { %v2508_v25 = vpop.eup %1848  ;;  %v578_v26 = vadd.f32 %v1608_v24, %v2445_v63  ;;  %v572_v27 = vpop.f32.mrb[17].mxu0 }
 0x13b   :  { %v2511_v28 = vpop.eup %1850  ;;  %v573_v29 = vadd.f32 %v572_v27, %v2443_v61 }
 0x13c   :  { %1860 = vtanh.f32 %v578_v26  ;;  %v1766_v30 = vpack.c.bf16 %v2508_v25, %v2511_v28  ;;  %v688_v25 = vld [vmem:[%s2714_s3 + $0x28] sm:$0xff]  ;;  %v687_v28 = vld [vmem:[%s2714_s3 + $0x20] sm:$0xff] }
 0x13d   :  { %1862 = vtanh.f32 %v573_v29  ;;  %v1611_v31 = vpop.f32.mrb[18].mxu0 }
 0x13e   :  { %v2516_v33 = vpop.eup %1852  ;;  %v588_v35 = vadd.f32 %v1611_v31, %v2447_v0  ;;  %v582_v37 = vpop.f32.mrb[19].mxu0  ;;  %v689_v31 = vld [vmem:[%s2714_s3 + $0x30] sm:$0xff] }
 0x13f   :  { %v2519_v38 = vpop.eup %1854  ;;  %v583_v63 = vadd.f32 %v582_v37, %v2452_v2  ;;  %v694_v37 = vld [vmem:[%s2714_s3 + $0x58] sm:$0xff] }
 0x140   :  { %1864 = vtanh.f32 %v588_v35  ;;  %v1770_v40 = vpack.c.bf16 %v2516_v33, %v2519_v38  ;;  %v692_v33 = vld [vmem:[%s2714_s3 + $0x48] sm:$0xff]  ;;  %v691_v35 = vld [vmem:[%s2714_s3 + $0x40] sm:$0xff]  ;;  %v693_v38 = vld [vmem:[%s2714_s3 + $0x50] sm:$0xff] }
 0x141   :  { %1866 = vtanh.f32 %v583_v63  ;;  %v1614_v61 = vpop.f32.mrb[20].mxu0  ;;  %v696_v63 = vld [vmem:[%s2714_s3 + $0x68] sm:$0xff] }
 0x142   :  { %v2524_v42 = vpop.eup %1856  ;;  %v598_v43 = vadd.f32 %v1614_v61, %v2454_v5  ;;  %v592_v45 = vpop.f32.mrb[21].mxu0  ;;  %v698_v61 = vld [vmem:[%s2714_s3 + $0x78] sm:$0xff] }
 0x143   :  { %v2527_v46 = vpop.eup %1858  ;;  %v593_v0 = vadd.f32 %v592_v45, %v2456_v6  ;;  %v699_v45 = vld [vmem:[%s2714_s3 + $0x80] sm:$0xff] }
 0x144   :  { %1868 = vtanh.f32 %v598_v43  ;;  %v1774_v47 = vpack.c.bf16 %v2524_v42, %v2527_v46  ;;  %v697_v42 = vld [vmem:[%s2714_s3 + $0x70] sm:$0xff]  ;;  %v700_v43 = vld [vmem:[%s2714_s3 + $0x88] sm:$0xff]  ;;  %v702_v46 = vld [vmem:[%s2714_s3 + $0x98] sm:$0xff] }
 0x145   :  { %1870 = vtanh.f32 %v593_v0  ;;  %v1617_v2 = vpop.f32.mrb[22].mxu0  ;;  %v701_v0 = vld [vmem:[%s2714_s3 + $0x90] sm:$0xff] }
 0x146   :  { %v1861_v49 = vpop.eup %1860  ;;  %v608_v51 = vadd.f32 %v1617_v2, %v2458_v9  ;;  %v602_v53 = vpop.f32.mrb[23].mxu0  ;;  %v703_v2 = vld [vmem:[%s2714_s3 + $0xa0] sm:$0xff] }
 0x147   :  { %v1863_v54 = vpop.eup %1862  ;;  %v603_v57 = vadd.f32 %v602_v53, %v2460_v10  ;;  %v708_v53 = vld [vmem:[%s2714_s3 + $0xc8] sm:$0xff] }
 0x148   :  { %1872 = vtanh.f32 %v608_v51  ;;  %v1744_v5 = vpack.c.bf16 %v1861_v49, %v1863_v54  ;;  %v706_v49 = vld [vmem:[%s2714_s3 + $0xb8] sm:$0xff]  ;;  %v705_v51 = vld [vmem:[%s2714_s3 + $0xb0] sm:$0xff]  ;;  %v707_v54 = vld [vmem:[%s2714_s3 + $0xc0] sm:$0xff] }
 0x149   :  { %1874 = vtanh.f32 %v603_v57  ;;  %v1620_v60 = vpop.f32.mrb[24].mxu0  ;;  %v710_v57 = vld [vmem:[%s2714_s3 + $0xd8] sm:$0xff] }
 0x14a   :  { %v1865_v1 = vpop.eup %1864  ;;  %v618_v6 = vadd.f32 %v1620_v60, %v2462_v13  ;;  %v612_v3 = vpop.f32.mrb[25].mxu0  ;;  %1745 = vmatprep.subr.bf16.mxu1 %v1744_v5  ;;  %v709_v5 = vld [vmem:[%s2714_s3 + $0xd0] sm:$0xff]  ;;  %v712_v60 = vld [vmem:[%s2714_s3 + $0xe8] sm:$0xff] }
 0x14b   :  { %v1867_v7 = vpop.eup %1866  ;;  %v613_v11 = vadd.f32 %v612_v3, %v2464_v14  ;;  %1747 = vmatpush3.bf16.msra.mxu1 %v1746_v41  ;;  %v713_v3 = vld [vmem:[%s2714_s3 + $0xf0] sm:$0xff] }
 0x14c   :  { %1876 = vtanh.f32 %v618_v6  ;;  %v1748_v9 = vpack.c.bf16 %v1865_v1, %v1867_v7  ;;  %v711_v1 = vld [vmem:[%s2714_s3 + $0xe0] sm:$0xff]  ;;  %v714_v6 = vld [vmem:[%s2714_s3 + $0xf8] sm:$0xff] }
 0x14d   :  { %1878 = vtanh.f32 %v613_v11  ;;  %v1623_v10 = vpop.f32.mrb[26].mxu0  ;;  %v972_v7 = vld [vmem:[%s2716_s5] sm:$0xff] }
 0x14e   :  { %v1869_v12 = vpop.eup %1868  ;;  %v628_v16 = vadd.f32 %v1623_v10, %v2466_v17  ;;  %v622_v19 = vpop.f32.mrb[27].mxu0  ;;  %1749 = vmatprep.subr.bf16.mxu1 %v1748_v9 }
 0x14f   :  { %v1871_v20 = vpop.eup %1870  ;;  %v623_v13 = vadd.f32 %v622_v19, %v2468_v18  ;;  %1751 = vmatpush3.bf16.msra.mxu1 %v1750_v50 }
 0x150   :  { %1880 = vtanh.f32 %v628_v16  ;;  %v1752_v14 = vpack.c.bf16 %v1869_v12, %v1871_v20  ;;  %v734_v12 = vpop.permute.xlu0 %733 }
 0x151   :  { %1882 = vtanh.f32 %v623_v13  ;;  %v1626_v36 = vpop.f32.mrb[28].mxu0 }
 0x152   :  { %v1873_v39 = vpop.eup %1872  ;;  %v638_v41 = vadd.f32 %v1626_v36, %v2470_v32  ;;  %v632_v22 = vpop.f32.mrb[29].mxu0  ;;  %1753 = vmatprep.subr.bf16.mxu1 %v1752_v14 }
 0x153   :  { %v1875_v24 = vpop.eup %1874  ;;  %v633_v17 = vadd.f32 %v632_v22, %v2472_v34  ;;  %1755 = vmatpush3.bf16.msra.mxu1 %v1754_v59  ;;  %v739_v14 = vpop.permute.xlu1 %738 }
 0x154   :  { %1884 = vtanh.f32 %v638_v41  ;;  %v1756_v18 = vpack.c.bf16 %v1873_v39, %v1875_v24  ;;  %v744_v24 = vpop.permute.xlu0 %743 }
 0x155   :  { %1886 = vtanh.f32 %v633_v17  ;;  %v1629_v44 = vpop.f32.mrb[30].mxu0 }
 0x156   :  { %v1877_v48 = vpop.eup %1876  ;;  %v648_v50 = vadd.f32 %v1629_v44, %v2490_v56  ;;  %v642_v26 = vpop.f32.mrb[31].mxu0  ;;  %1757 = vmatprep.subr.bf16.mxu1 %v1756_v18 }
 0x157   :  { %v1879_v27 = vpop.eup %1878  ;;  %v643_v32 = vadd.f32 %v642_v26, %v2492_v58  ;;  %1759 = vmatpush3.bf16.msra.mxu1 %v1758_v8 }
 0x158   :  { %1888 = vtanh.f32 %v648_v50  ;;  %v1760_v34 = vpack.c.bf16 %v1877_v48, %v1879_v27  ;;  %v749_v50 = vpop.permute.xlu1 %748 }
 0x159   :  { %1890 = vtanh.f32 %v643_v32 }
 0x15a   :  { %v1881_v52 = vpop.eup %1880  ;;  %1761 = vmatprep.subr.bf16.mxu1 %v1760_v34 }
 0x15b   :  { %v1883_v55 = vpop.eup %1882  ;;  %1763 = vmatpush3.bf16.msra.mxu1 %v1762_v23  ;;  %v685_v23 = vld [vmem:[%s2714_s3 + $0x10] sm:$0xff] }
 0x15c   :  { %v1764_v56 = vpack.c.bf16 %v1881_v52, %v1883_v55 }
 0x15e   :  { %v1885_v59 = vpop.eup %1884  ;;  %1765 = vmatprep.subr.bf16.mxu1 %v1764_v56  ;;  %v754_v56 = vpop.permute.xlu0 %753 }
 0x15f   :  { %v1887_v29 = vpop.eup %1886  ;;  %1767 = vmatpush3.bf16.msra.mxu1 %v1766_v30  ;;  %v690_v30 = vld [vmem:[%s2714_s3 + $0x38] sm:$0xff] }
 0x160   :  { %v1768_v58 = vpack.c.bf16 %v1885_v59, %v1887_v29 }
 0x162   :  { %v1889_v62 = vpop.eup %1888  ;;  %1769 = vmatprep.subr.bf16.mxu1 %v1768_v58 }
 0x163   :  { %v1891_v4 = vpop.eup %1890  ;;  %1771 = vmatpush3.bf16.msra.mxu1 %v1770_v40  ;;  %v695_v40 = vld [vmem:[%s2714_s3 + $0x60] sm:$0xff] }
 0x164   :  { %v1772_v8 = vpack.c.bf16 %v1889_v62, %v1891_v4 }
 0x166   :  { %1773 = vmatprep.subr.bf16.mxu1 %v1772_v8  ;;  %v759_v8 = vpop.permute.xlu1 %758 }
 0x167   :  { %1775 = vmatpush3.bf16.msra.mxu1 %v1774_v47  ;;  %v704_v47 = vld [vmem:[%s2714_s3 + $0xa8] sm:$0xff] }
 0x16a   :  { %876 = vmatmul.mubr.f32.vlgmr.msra.gmra.mrb[0].mxu1 %v683_v15 }
 0x16b   :  { %880 = vmatprep.mubr.f32.mxu1 %v686_v21 }
 0x16e   :  { %881 = vmatmul.mubr.f32.gmra.mrb[2].mxu1 %v685_v23 }
 0x16f   :  { %885 = vmatprep.mubr.f32.mxu1 %v688_v25 }
 0x172   :  { %886 = vmatmul.mubr.f32.gmra.mrb[4].mxu1 %v687_v28 }
 0x173   :  { %890 = vmatprep.mubr.f32.mxu1 %v690_v30 }
 0x176   :  { %891 = vmatmul.mubr.f32.gmra.mrb[6].mxu1 %v689_v31  ;;  %v764_v31 = vpop.permute.xlu0 %763 }
 0x177   :  { %895 = vmatprep.mubr.f32.mxu1 %v692_v33 }
 0x17a   :  { %896 = vmatmul.mubr.f32.gmra.mrb[8].mxu1 %v691_v35 }
 0x17b   :  { %900 = vmatprep.mubr.f32.mxu1 %v694_v37 }
 0x17e   :  { %901 = vmatmul.mubr.f32.gmra.mrb[10].mxu1 %v693_v38 }
 0x17f   :  { %905 = vmatprep.mubr.f32.mxu1 %v696_v63 }
 0x182   :  { %906 = vmatmul.mubr.f32.gmra.mrb[12].mxu1 %v695_v40  ;;  %v769_v40 = vpop.permute.xlu1 %768 }
 0x183   :  { %910 = vmatprep.mubr.f32.mxu1 %v698_v61 }
 0x186   :  { %911 = vmatmul.mubr.f32.gmra.mrb[14].mxu1 %v697_v42 }
 0x187   :  { %915 = vmatprep.mubr.f32.mxu1 %v700_v43 }
 0x18a   :  { %916 = vmatmul.mubr.f32.gmra.mrb[16].mxu1 %v699_v45 }
 0x18b   :  { %920 = vmatprep.mubr.f32.mxu1 %v702_v46 }
 0x18e   :  { %921 = vmatmul.mubr.f32.gmra.mrb[18].mxu1 %v701_v0 }
 0x18f   :  { %925 = vmatprep.mubr.f32.mxu1 %v704_v47  ;;  %v774_v47 = vpop.permute.xlu0 %773 }
 0x192   :  { %926 = vmatmul.mubr.f32.gmra.mrb[20].mxu1 %v703_v2 }
 0x193   :  { %930 = vmatprep.mubr.f32.mxu1 %v706_v49 }
 0x196   :  { %931 = vmatmul.mubr.f32.gmra.mrb[22].mxu1 %v705_v51 }
 0x197   :  { %935 = vmatprep.mubr.f32.mxu1 %v708_v53 }
 0x19a   :  { %936 = vmatmul.mubr.f32.gmra.mrb[24].mxu1 %v707_v54 }
 0x19b   :  { %940 = vmatprep.mubr.f32.mxu1 %v710_v57  ;;  %v779_v57 = vpop.permute.xlu1 %778 }
 0x19e   :  { %941 = vmatmul.mubr.f32.gmra.mrb[26].mxu1 %v709_v5 }
 0x19f   :  { %945 = vmatprep.mubr.f32.mxu1 %v712_v60 }
 0x1a2   :  { %946 = vmatmul.mubr.f32.gmra.mrb[28].mxu1 %v711_v1 }
 0x1a3   :  { %950 = vmatprep.mubr.f32.mxu1 %v714_v6 }
 0x1a6   :  { %951 = vmatmul.mubr.f32.gmra.mrb[30].mxu1 %v713_v3 }
 0x1a7   :  { %1662 = vmatprep.mubr.f32.mxu1 %v972_v7 }
 0x23d   :  { %v1466_v11 = vpop.f32.mrb[0].mxu1 }
 0x23e   :  { %v1467_v9 = vpop.f32.mrb[1].mxu1 }
 0x23f   :  { %v1468_v10 = vadd.f32 %v1467_v9, %v1466_v11  ;;  %v784_v11 = vpop.permute.xlu0 %783 }
 0x241   :  { %v1469_v16 = vpop.f32.mrb[2].mxu1  ;;  %v878_v19 = vadd.f32 %v1468_v10, %v734_v12 }
 0x242   :  { %v1470_v20 = vpop.f32.mrb[3].mxu1 }
 0x243   :  { %v1471_v13 = vadd.f32 %v1470_v20, %v1469_v16  ;;  %1892 = vtanh.f32 %v878_v19  ;;  %v789_v20 = vpop.permute.xlu1 %788 }
 0x245   :  { %v883_v36 = vadd.f32 %v1471_v13, %v739_v14  ;;  %v1472_v39 = vpop.f32.mrb[4].mxu1 }
 0x246   :  { %v1473_v41 = vpop.f32.mrb[5].mxu1 }
 0x247   :  { %1894 = vtanh.f32 %v883_v36  ;;  %v1474_v22 = vadd.f32 %v1473_v41, %v1472_v39 }
 0x249   :  { %v1475_v17 = vpop.f32.mrb[6].mxu1  ;;  %v888_v18 = vadd.f32 %v1474_v22, %v744_v24  ;;  %v794_v24 = vpop.permute.xlu0 %793 }
 0x24a   :  { %v1476_v44 = vpop.f32.mrb[7].mxu1 }
 0x24b   :  { %v1477_v48 = vadd.f32 %v1476_v44, %v1475_v17  ;;  %1896 = vtanh.f32 %v888_v18 }
 0x24d   :  { %v893_v26 = vadd.f32 %v1477_v48, %v749_v50  ;;  %v1478_v27 = vpop.f32.mrb[8].mxu1  ;;  %v1893_v52 = vpop.eup %1892 }
 0x24e   :  { %v1479_v32 = vpop.f32.mrb[9].mxu1 }
 0x24f   :  { %1898 = vtanh.f32 %v893_v26  ;;  %v1480_v34 = vadd.f32 %v1479_v32, %v1478_v27  ;;  %v799_v26 = vpop.permute.xlu1 %798 }
 0x251   :  { %v1895_v55 = vpop.eup %1894  ;;  %v1481_v59 = vpop.f32.mrb[10].mxu1  ;;  %v898_v29 = vadd.f32 %v1480_v34, %v754_v56 }
 0x252   :  { %v1482_v58 = vpop.f32.mrb[11].mxu1  ;;  %v1776_v62 = vpack.c.bf16 %v1895_v55, %v1893_v52 }
 0x253   :  { %v1483_v4 = vadd.f32 %v1482_v58, %v1481_v59  ;;  %1900 = vtanh.f32 %v898_v29  ;;  %v804_v59 = vpop.permute.xlu0 %803 }
 0x254   :  { %1777 = vmatprep.subr.bf16.mxu1 %v1776_v62 }
 0x255   :  { %v903_v15 = vadd.f32 %v1483_v4, %v759_v8  ;;  %v1484_v21 = vpop.f32.mrb[12].mxu1  ;;  %1779 = vmatpush3.bf16.msra.mxu1 %v1776_v62  ;;  %v1897_v28 = vpop.eup %1896 }
 0x256   :  { %v1485_v23 = vpop.f32.mrb[13].mxu1 }
 0x257   :  { %1902 = vtanh.f32 %v903_v15  ;;  %v1486_v25 = vadd.f32 %v1485_v23, %v1484_v21  ;;  %v809_v15 = vpop.permute.xlu1 %808 }
 0x259   :  { %v1899_v30 = vpop.eup %1898  ;;  %v1487_v33 = vpop.f32.mrb[14].mxu1  ;;  %v908_v35 = vadd.f32 %v1486_v25, %v764_v31 }
 0x25a   :  { %v1488_v37 = vpop.f32.mrb[15].mxu1  ;;  %v1780_v38 = vpack.c.bf16 %v1899_v30, %v1897_v28 }
 0x25b   :  { %v1489_v63 = vadd.f32 %v1488_v37, %v1487_v33  ;;  %1904 = vtanh.f32 %v908_v35  ;;  %v973_v35 = vld [vmem:[%s2716_s5 + $0x8] sm:$0xff]  ;;  %v974_v37 = vld [vmem:[%s2716_s5 + $0x10] sm:$0xff] }
 0x25c   :  { %1781 = vmatprep.subr.bf16.mxu1 %v1780_v38 }
 0x25d   :  { %v913_v61 = vadd.f32 %v1489_v63, %v769_v40  ;;  %v1490_v42 = vpop.f32.mrb[16].mxu1  ;;  %1783 = vmatpush3.bf16.msra.mxu1 %v1780_v38  ;;  %v1901_v46 = vpop.eup %1900  ;;  %v975_v38 = vld [vmem:[%s2716_s5 + $0x18] sm:$0xff]  ;;  %v976_v63 = vld [vmem:[%s2716_s5 + $0x20] sm:$0xff]  ;;  %v977_v40 = vld [vmem:[%s2716_s5 + $0x28] sm:$0xff] }
 0x25e   :  { %v1491_v43 = vpop.f32.mrb[17].mxu1 }
 0x25f   :  { %1906 = vtanh.f32 %v913_v61  ;;  %v1492_v45 = vadd.f32 %v1491_v43, %v1490_v42  ;;  %v978_v61 = vld [vmem:[%s2716_s5 + $0x30] sm:$0xff]  ;;  %v979_v42 = vld [vmem:[%s2716_s5 + $0x38] sm:$0xff]  ;;  %v1141_v43 = vld [vmem:[%s2718_s7] sm:$0xff] }
 0x261   :  { %v1903_v0 = vpop.eup %1902  ;;  %v1493_v2 = vpop.f32.mrb[18].mxu1  ;;  %v918_v49 = vadd.f32 %v1492_v45, %v774_v47 }
 0x262   :  { %v1494_v51 = vpop.f32.mrb[19].mxu1  ;;  %v1784_v53 = vpack.c.bf16 %v1903_v0, %v1901_v46  ;;  %v996_v45 = vpop.permute.xlu1 %995 }
 0x263   :  { %v1495_v54 = vadd.f32 %v1494_v51, %v1493_v2  ;;  %1908 = vtanh.f32 %v918_v49  ;;  %v991_v46 = vpop.permute.xlu0 %990 }
 0x264   :  { %1785 = vmatprep.subr.bf16.mxu1 %v1784_v53 }
 0x265   :  { %v923_v5 = vadd.f32 %v1495_v54, %v779_v57  ;;  %v1496_v60 = vpop.f32.mrb[20].mxu1  ;;  %1787 = vmatpush3.bf16.msra.mxu1 %v1784_v53  ;;  %v1905_v3 = vpop.eup %1904 }
 0x266   :  { %v1497_v1 = vpop.f32.mrb[21].mxu1  ;;  %v1006_v0 = vpop.permute.xlu1 %1005 }
 0x267   :  { %1910 = vtanh.f32 %v923_v5  ;;  %v1498_v6 = vadd.f32 %v1497_v1, %v1496_v60  ;;  %v1001_v2 = vpop.permute.xlu0 %1000 }
 0x269   :  { %v1907_v7 = vpop.eup %1906  ;;  %v1499_v9 = vpop.f32.mrb[22].mxu1  ;;  %v928_v10 = vadd.f32 %v1498_v6, %v784_v11 }
 0x26a   :  { %v1500_v12 = vpop.f32.mrb[23].mxu1  ;;  %v1788_v16 = vpack.c.bf16 %v1907_v7, %v1905_v3  ;;  %v1016_v60 = vpop.permute.xlu1 %1015 }
 0x26b   :  { %v1501_v19 = vadd.f32 %v1500_v12, %v1499_v9  ;;  %1912 = vtanh.f32 %v928_v10  ;;  %v1011_v6 = vpop.permute.xlu0 %1010 }
 0x26c   :  { %1789 = vmatprep.subr.bf16.mxu1 %v1788_v16 }
 0x26d   :  { %v933_v13 = vadd.f32 %v1501_v19, %v789_v20  ;;  %v1502_v14 = vpop.f32.mrb[24].mxu1  ;;  %1791 = vmatpush3.bf16.msra.mxu1 %v1788_v16  ;;  %v1909_v41 = vpop.eup %1908 }
 0x26e   :  { %v1503_v36 = vpop.f32.mrb[25].mxu1  ;;  %v1026_v10 = vpop.permute.xlu1 %1025 }
 0x26f   :  { %1914 = vtanh.f32 %v933_v13  ;;  %v1504_v39 = vadd.f32 %v1503_v36, %v1502_v14  ;;  %v1021_v19 = vpop.permute.xlu0 %1020 }
 0x271   :  { %v1911_v22 = vpop.eup %1910  ;;  %v1505_v17 = vpop.f32.mrb[26].mxu1  ;;  %v938_v18 = vadd.f32 %v1504_v39, %v794_v24 }
 0x272   :  { %v1506_v44 = vpop.f32.mrb[27].mxu1  ;;  %v1792_v48 = vpack.c.bf16 %v1911_v22, %v1909_v41 }
 0x273   :  { %v1507_v50 = vadd.f32 %v1506_v44, %v1505_v17  ;;  %1916 = vtanh.f32 %v938_v18 }
 0x274   :  { %1793 = vmatprep.subr.bf16.mxu1 %v1792_v48 }
 0x275   :  { %v943_v27 = vadd.f32 %v1507_v50, %v799_v26  ;;  %v1508_v32 = vpop.f32.mrb[28].mxu1  ;;  %1795 = vmatpush3.bf16.msra.mxu1 %v1792_v48  ;;  %v1913_v55 = vpop.eup %1912 }
 0x276   :  { %v1509_v34 = vpop.f32.mrb[29].mxu1 }
 0x277   :  { %1918 = vtanh.f32 %v943_v27  ;;  %v1510_v52 = vadd.f32 %v1509_v34, %v1508_v32  ;;  %v1142_v27 = vld [vmem:[%s2718_s7 + $0x8] sm:$0xff]  ;;  %v1143_v32 = vld [vmem:[%s2718_s7 + $0x10] sm:$0xff]  ;;  %v1144_v34 = vld [vmem:[%s2718_s7 + $0x18] sm:$0xff]  ;;  %s1973_s7 = smov [#allocation3]  }
 0x278   :  { %s1326_s26 = sshll.u32 %s1973_s7, 4  ;;  %s1327_s26 = int_to_ptr.vmem [resolvable:$true] %s1326_s26 }
 0x279   :  { %v1915_v56 = vpop.eup %1914  ;;  %v1511_v29 = vpop.f32.mrb[30].mxu1  ;;  %v948_v58 = vadd.f32 %v1510_v52, %v804_v59  ;;  %s1948_s27 = scalar_lea.vmem %s1327_s26, 16  ;;  %s1952_s28 = scalar_lea.vmem %s1327_s26, 32 }
 0x27a   :  { %v1512_v62 = vpop.f32.mrb[31].mxu1  ;;  %v1796_v4 = vpack.c.bf16 %v1915_v56, %v1913_v55  ;;  %v1157_v52 = vpop.permute.xlu1 %1156  ;;  %p1949_p0 = scmp.ne.s32.totalorder %s1327_s26, %s1948_s27  ;;  %p1953_p1 = scmp.lt.s32.totalorder %s1327_s26, %s1327_s26 }
 0x27b   :  { %v1513_v8 = vadd.f32 %v1512_v62, %v1511_v29  ;;  %1920 = vtanh.f32 %v948_v58  ;;  %v1152_v55 = vpop.permute.xlu0 %1151  ;;  %p1954_p2 = scmp.lt.s32.totalorder %s1952_s28, %s1948_s27 }
 0x27c   :  { %1797 = vmatprep.subr.bf16.mxu1 %v1796_v4 }
 0x27d   :  { %v953_v21 = vadd.f32 %v1513_v8, %v809_v15  ;;  %1799 = vmatpush3.bf16.msra.mxu1 %v1796_v4  ;;  %v1917_v23 = vpop.eup %1916  ;;  %p1955_p3 = por %p1954_p2, %p1953_p1 }
 0x27e   :  { %v1167_v62 = vpop.permute.xlu1 %1166 }
 0x27f   :  { %1922 = vtanh.f32 %v953_v21  ;;  %v1162_v8 = vpop.permute.xlu0 %1161  ;;  %p1956_p4 = pnand %p1955_p3, %p1949_p0 }
 0x281   :  { %v1919_v25 = vpop.eup %1918 }
 0x282   :  { %v1800_v28 = vpack.c.bf16 %v1919_v25, %v1917_v23 }
 0x283   :  { %v1278_v25 = vpop.permute.xlu0 %1277 }
 0x284   :  { %1801 = vmatprep.subr.bf16.mxu1 %v1800_v28 }
 0x285   :  { %1803 = vmatpush3.bf16.msra.mxu1 %v1800_v28  ;;  %v1921_v30 = vpop.eup %1920 }
 0x289   :  { %v1923_v31 = vpop.eup %1922 }
 0x28a   :  { %v1804_v33 = vpack.c.bf16 %v1923_v31, %v1921_v30  ;;  %v1283_v30 = vpop.permute.xlu1 %1282 }
 0x28c   :  { %1805 = vmatprep.subr.bf16.mxu1 %v1804_v33 }
 0x28d   :  { %1807 = vmatpush3.bf16.msra.mxu1 %v1804_v33 }
 0x290   :  { %1663 = vmatmul.mubr.f32.vlgmr.msra.gmra.mrb[32].mxu1 %v973_v35 }
 0x291   :  { %1665 = vmatprep.mubr.f32.mxu1 %v974_v37 }
 0x294   :  { %1666 = vmatmul.mubr.f32.gmra.mrb[34].mxu1 %v975_v38 }
 0x295   :  { %1668 = vmatprep.mubr.f32.mxu1 %v976_v63 }
 0x298   :  { %1669 = vmatmul.mubr.f32.gmra.mrb[36].mxu1 %v977_v40  ;;  %v1288_v40 = vpop.permute.xlu0 %1287 }
 0x299   :  { %1671 = vmatprep.mubr.f32.mxu1 %v978_v61 }
 0x29c   :  { %1672 = vmatmul.mubr.f32.gmra.mrb[38].mxu1 %v979_v42  ;;  %v1293_v42 = vpop.permute.xlu1 %1292 }
 0x29d   :  { %1690 = vmatprep.mubr.msk.f32.mxu1 %vm1169_vm2, %v1141_v43 }
 0x363   :  { %v1664_v47 = vpop.f32.mrb[32].mxu1 }
 0x364   :  { %v1100_v49 = vadd.f32 %v1664_v47, %v996_v45  ;;  %v1094_v51 = vpop.f32.mrb[33].mxu1 }
 0x365   :  { %v1095_v53 = vadd.f32 %v1094_v51, %v991_v46  ;;  %v1314_v46 = vlaneseq }
 0x366   :  { %1924 = vtanh.f32 %v1100_v49 }
 0x367   :  { %1926 = vtanh.f32 %v1095_v53  ;;  %v1667_v54 = vpop.f32.mrb[34].mxu1 }
 0x368   :  { %v1110_v57 = vadd.f32 %v1667_v54, %v1006_v0  ;;  %v1104_v5 = vpop.f32.mrb[35].mxu1 }
 0x369   :  { %v1105_v1 = vadd.f32 %v1104_v5, %v1001_v2  ;;  %v1315_v2 = vshrl.u32 %v1314_v46, 7 }
 0x36a   :  { %1928 = vtanh.f32 %v1110_v57  ;;  %v1312_v57 = vpop.permute.xlu0 %1311 }
 0x36b   :  { %1930 = vtanh.f32 %v1105_v1  ;;  %v1670_v3 = vpop.f32.mrb[36].mxu1  ;;  %v1316_v53 = vsub.s32 0, %v1315_v2 }
 0x36c   :  { %v1120_v7 = vadd.f32 %v1670_v3, %v1016_v60  ;;  %v1114_v11 = vpop.f32.mrb[37].mxu1 }
 0x36d   :  { %v1115_v9 = vadd.f32 %v1114_v11, %v1011_v6  ;;  %v1317_v60 = vrot.slane %v1312_v57, %v1316_v53 }
 0x36e   :  { %1932 = vtanh.f32 %v1120_v7 }
 0x36f   :  { %1934 = vtanh.f32 %v1115_v9  ;;  %v1673_v12 = vpop.f32.mrb[38].mxu1 }
 0x370   :  { %v1925_v16 = vpop.eup %1924  ;;  %v1130_v20 = vadd.f32 %v1673_v12, %v1026_v10  ;;  %v1124_v13 = vpop.f32.mrb[39].mxu1 }
 0x371   :  { %v1927_v14 = vpop.eup %1926  ;;  %v1125_v36 = vadd.f32 %v1124_v13, %v1021_v19 }
 0x372   :  { %1936 = vtanh.f32 %v1130_v20  ;;  %v1808_v39 = vpack.c.bf16 %v1925_v16, %v1927_v14 }
 0x373   :  { %1938 = vtanh.f32 %v1125_v36 }
 0x374   :  { %v1929_v41 = vpop.eup %1928  ;;  %1809 = vmatprep.subr.bf16.mxu1 %v1808_v39 }
 0x375   :  { %v1931_v22 = vpop.eup %1930  ;;  %1811 = vmatpush3.bf16.msra.mxu1 %v1808_v39 }
 0x376   :  { %v1812_v24 = vpack.c.bf16 %v1929_v41, %v1931_v22 }
 0x378   :  { %v1933_v17 = vpop.eup %1932  ;;  %1813 = vmatprep.subr.bf16.mxu1 %v1812_v24 }
 0x379   :  { %v1935_v18 = vpop.eup %1934  ;;  %1815 = vmatpush3.bf16.msra.mxu1 %v1812_v24 }
 0x37a   :  { %v1816_v44 = vpack.c.bf16 %v1933_v17, %v1935_v18 }
 0x37c   :  { %v1937_v48 = vpop.eup %1936  ;;  %1817 = vmatprep.subr.bf16.mxu1 %v1816_v44 }
 0x37d   :  { %v1939_v50 = vpop.eup %1938  ;;  %1819 = vmatpush3.bf16.msra.mxu1 %v1816_v44 }
 0x37e   :  { %v1820_v26 = vpack.c.bf16 %v1937_v48, %v1939_v50 }
 0x380   :  { %1821 = vmatprep.subr.bf16.mxu1 %v1820_v26 }
 0x381   :  { %1823 = vmatpush3.bf16.msra.mxu1 %v1820_v26 }
 0x384   :  { %1691 = vmatmul.mubr.msk.f32.vlgmr.msra.gmra.mrb[40].mxu1 %vm1169_vm2, %v1142_v27 }
 0x385   :  { %1693 = vmatprep.mubr.msk.f32.mxu1 %vm1169_vm2, %v1143_v32 }
 0x388   :  { %1694 = vmatmul.mubr.msk.f32.gmra.mrb[42].mxu1 %vm1169_vm2, %v1144_v34 }
 0x457   :  { %v1692_v56 = vpop.f32.mrb[40].mxu1 }
 0x458   :  { %v1254_v59 = vadd.f32 %v1692_v56, %v1157_v52  ;;  %v1248_v29 = vpop.f32.mrb[41].mxu1 }
 0x459   :  { %v1249_v58 = vadd.f32 %v1248_v29, %v1152_v55 }
 0x45a   :  { %1940 = vtanh.f32 %v1254_v59 }
 0x45b   :  { %1942 = vtanh.f32 %v1249_v58  ;;  %v1695_v4 = vpop.f32.mrb[42].mxu1 }
 0x45c   :  { %v1264_v15 = vadd.f32 %v1695_v4, %v1167_v62  ;;  %v1258_v21 = vpop.f32.mrb[43].mxu1 }
 0x45d   :  { %v1259_v23 = vadd.f32 %v1258_v21, %v1162_v8 }
 0x45e   :  { %1944 = vtanh.f32 %v1264_v15 }
 0x45f   :  { %1946 = vtanh.f32 %v1259_v23 }
 0x464   :  { %v1941_v28 = vpop.eup %1940 }
 0x465   :  { %v1943_v31 = vpop.eup %1942  ;;  %v1296_v33 = vmul.f32 %v1941_v28, %v1283_v30 }
 0x466   :  { %v1295_v35 = vmul.f32 %v1943_v31, %v1278_v25 }
 0x468   :  { %v1945_v37 = vpop.eup %1944  ;;  %v1299_v38 = vadd.f32 %v1296_v33, %v1295_v35 }
 0x469   :  { %v1947_v63 = vpop.eup %1946  ;;  %v1298_v43 = vmul.f32 %v1945_v37, %v1293_v42 }
 0x46a   :  { %v1297_v61 = vmul.f32 %v1947_v63, %v1288_v40 }
 0x46c   :  { %v1300_v45 = vadd.f32 %v1299_v38, %v1297_v61 }
 0x46e   :  { %v1301_v0 = vadd.f32 %v1300_v45, %v1298_v43 }
 0x470   :  { %v1302_v47 = vrot.slane %v1301_v0, 4 }
 0x472   :  { %v1303_v49 = vadd.f32 %v1302_v47, %v1301_v0 }
 0x474   :  { %v1304_v51 = vrot.slane %v1303_v49, 2 }
 0x476   :  { %v1305_v54 = vadd.f32 %v1304_v51, %v1303_v49 }
 0x478   :  { %v1306_v5 = vrot.slane %v1305_v54, 1 }
 0x47a   :  { %v1307_v1 = vadd.f32 %v1306_v5, %v1305_v54 }
 0x47c   :  { %v1318_v6 = vadd.f32 %v1317_v60, %v1307_v1 }
 0x47e   :  { %1319 = vst [vmem:[#allocation3] sm:$0x1] %v1318_v6 }
 0x47f   :  { %1959 = shalt.err (!%p1956_p4)
}
 0x480   :  { %s1960_s12 = scalar_lea.hbm %s2722_s11, 16 }
 0x481   :  { %p1961_p5 = scmp.ne.s32.totalorder %s2722_s11, %s1960_s12  ;;  %p1964_p6 = scmp.lt.u32.totalorder %s1960_s12, %s2722_s11 }
 0x483   :  { %p1966_p7 = pnand %p1964_p6, %p1961_p5 }
 0x485   :  { %1969 = shalt.err (!%p1966_p7)
}
 0x486   :  { %1329 = dma.vmem_to_hbm [thread:$0]  %s1327_s26, 16, %s2722_s11, [#allocation4]  }
 0x487   :  { %1970 = dma.done.wait [#allocation4], 16  }
 0x488   :  { %1971 = vsyncadd [#allocation4], 4294967280 }
 0x489   :  { %1333 = vsyncpa [#allocation4], 1 }

</bundles_post_ra>
